<compile_context>
chip_gen: v5e
topology: v5e:2x2
jax: 0.10.0
libtpu: 0.0.40
codegen_flags: <defaults>
</compile_context>

<pallas_src>
import functools

import jax
import jax.numpy as jnp
import numpy as np
from jax.experimental import pallas as pl
from jax.experimental.pallas import tpu as pltpu  # noqa: F401  (kept for TPU-specific extensions)


def _erf(x):
    # Abramowitz & Stegun 7.1.26 polynomial approximation (max abs err ~1.5e-7).
    # Exact division (review: approx reciprocal propagated ~1e-3 error through t^1..t^5).
    a1, a2, a3, a4, a5 = 0.254829592, -0.284496736, 1.421413741, -1.453152027, 1.061405429
    p = 0.3275911
    s = jnp.where(x >= 0.0, 1.0, -1.0)
    ax = jnp.abs(x)
    t = 1.0 / (1.0 + p * ax)
    poly = ((((a5 * t + a4) * t + a3) * t + a2) * t + a1) * t
    return s * (1.0 - poly * jnp.exp(-ax * ax))


def _gelu_exact(x):
    return 0.5 * x * (1.0 + _erf(x * 0.7071067811865476))


def dual_kernel(p_ref, w2_ref, wdw_ref, bias_ref, o_ref, *, eps):
    """Single invocation; batch folded into the lane (pixel) axis.

    p_ref    : (KPAD, B*HW)  bf16   zero-padded im2col patches (KPAD = 128)
    w2_ref   : (MID, KPAD)   bf16   flattened + zero-padded 9x3 conv weight
    wdw_ref  : (OUT, MID)    bf16   1x1 conv weight, pre-scaled by LN gamma
    bias_ref : (OUT, 1)      f32    wdw @ beta (folded LN shift)
    o_ref    : (OUT, B*HW)   f32    lane-dense output (B*HW multiple of 128)
    """
    # ---- 9x3 conv: one im2col matmul on the MXU, f32 accumulation ----
    acc = jnp.dot(w2_ref[...], p_ref[...],
                  preferred_element_type=jnp.float32)          # (MID, B*HW)

    # ---- LayerNorm over the channel (sublane) axis, f32 stats ----
    # (affine is folded into wdw_scaled / bias, so only normalization here)
    mean = jnp.mean(acc, axis=0, keepdims=True)                # (1, B*HW)
    var = jnp.mean((acc - mean) ** 2, axis=0, keepdims=True)
    xn = (acc - mean) * jax.lax.rsqrt(var + eps)

    # ---- 1x1 conv (gamma folded into weight) + folded beta bias ----
    y = jnp.dot(wdw_ref[...], xn.astype(wdw_ref.dtype),
                preferred_element_type=jnp.float32) + bias_ref[...]   # (OUT, B*HW)

    # ---- exact (erf) GELU in f32, lane-dense store ----
    o_ref[...] = _gelu_exact(y).astype(o_ref.dtype)


def dual_forward(x_nchw, wconv_oihw, gamma, beta, wdw_oihw, ks=(9, 3), eps=1e-6):
    """x_nchw: (B, Cin, H, W). Weights kept in PyTorch layouts, flattened here."""
    B, Cin, H, W = x_nchw.shape
    KH, KW = ks
    MID = wconv_oihw.shape[0]
    OUT = wdw_oihw.shape[0]
    ph, pw = KH // 2, KW // 2
    HW = H * W
    BHW = B * HW
    K = Cin * KH * KW
    KPAD = max(128, ((K + 127) // 128) * 128)   # pad contraction dim for clean vreg packing

    # ---- glue: bf16 im2col (pad + 27 slices + stack), batch folded into lanes ----
    xb = x_nchw.astype(jnp.bfloat16)                            # cast early: half-size intermediate
    xp = jnp.pad(xb, ((0, 0), (0, 0), (ph, ph), (pw, pw)))      # (B, Cin, Hp, Wp)
    taps = [xp[:, :, kh:kh + H, kw:kw + W]                      # each (B, Cin, H, W)
            for kh in range(KH) for kw in range(KW)]
    patches = jnp.stack(taps, axis=2)                           # (B, Cin, KH*KW, H, W)
    patches = patches.reshape(B, K, HW)
    patches = jnp.transpose(patches, (1, 0, 2)).reshape(K, BHW)  # (K, B*HW)
    patches = jnp.pad(patches, ((0, KPAD - K), (0, 0)))          # zero rows contribute nothing

    w2 = wconv_oihw.reshape(MID, K).astype(jnp.bfloat16)         # (MID, K)
    w2 = jnp.pad(w2, ((0, 0), (0, KPAD - K)))                    # (MID, KPAD)

    # ---- fold the LayerNorm affine into the 1x1 conv ----
    wdw = wdw_oihw[:, :, 0, 0].astype(jnp.float32)               # (OUT, MID)
    wdw_scaled = (wdw * gamma.astype(jnp.float32)[None, :]).astype(jnp.bfloat16)
    bias = (wdw @ beta.astype(jnp.float32)).reshape(OUT, 1)      # (OUT, 1) f32

    kernel = functools.partial(dual_kernel, eps=eps)

    # Single step, whole-array VMEM blocks (<200 KiB working set; fits every chip).
    # TODO(synk): add an HW-tiling grid axis if B*H*W ever grows beyond VMEM.
    out = pl.pallas_call(
        kernel,
        out_shape=jax.ShapeDtypeStruct((OUT, BHW), jnp.float32),
    )(patches, w2, wdw_scaled, bias)

    return jnp.transpose(out.reshape(OUT, B, H, W), (1, 0, 2, 3))  # (B, OUT, H, W)


def dual_reference(x_nchw, wconv_oihw, gamma, beta, wdw_oihw, ks=(9, 3), eps=1e-6):
    """Pure-JAX f32 reference matching the PyTorch forward."""
    KH, KW = ks
    y = jax.lax.conv_general_dilated(
        x_nchw.astype(jnp.float32), wconv_oihw.astype(jnp.float32),
        window_strides=(1, 1), padding=((KH // 2, KH // 2), (KW // 2, KW // 2)),
        dimension_numbers=('NCHW', 'OIHW', 'NCHW'),
        precision=jax.lax.Precision.HIGHEST)
    y = jnp.transpose(y, (0, 2, 3, 1))
    mean = jnp.mean(y, -1, keepdims=True)
    var = jnp.mean((y - mean) ** 2, -1, keepdims=True)
    y = (y - mean) * jax.lax.rsqrt(var + eps) * gamma + beta
    y = jnp.transpose(y, (0, 3, 1, 2))
    y = jax.lax.conv_general_dilated(
        y, wdw_oihw.astype(jnp.float32), (1, 1), 'VALID',
        dimension_numbers=('NCHW', 'OIHW', 'NCHW'),
        precision=jax.lax.Precision.HIGHEST)
    return jax.nn.gelu(y, approximate=False)


if __name__ == "__main__":
    # Shapes consistent with the module: dual(in_c=4, out_c=8, ks=(9,3)) -> mid_c=8
    B, IN_C, OUT_C, H, W = 2, 4, 8, 16, 16
    KS = (9, 3)
    MID_C = OUT_C

    key = jax.random.PRNGKey(0)
    kx, kw1, kw2, kg, kb = jax.random.split(key, 5)

    x = jax.random.normal(kx, (B, IN_C, H, W), dtype=jnp.float32)
    w_conv = jax.random.normal(kw1, (MID_C, IN_C, KS[0], KS[1]), dtype=jnp.float32) * 0.1
    w_dw = jax.random.normal(kw2, (OUT_C, MID_C, 1, 1), dtype=jnp.float32) * 0.1
    ln_gamma = 1.0 + 0.1 * jax.random.normal(kg, (MID_C,), dtype=jnp.float32)
    ln_beta = 0.05 * jax.random.normal(kb, (MID_C,), dtype=jnp.float32)

    out = dual_forward(x, w_conv, ln_gamma, ln_beta, w_dw, ks=KS)
    out = jax.block_until_ready(out)

    ref = jax.block_until_ready(dual_reference(x, w_conv, ln_gamma, ln_beta, w_dw, ks=KS))
    # bf16 MXU operands (with f32 accumulation / f32 LayerNorm stats / f32 GELU)
    # compared against an f32 HIGHEST-precision reference: 1e-2 leaves headroom.
    if not np.allclose(np.asarray(out), np.asarray(ref), atol=1e-2, rtol=1e-2):
        raise AssertionError("Pallas kernel output does not match JAX reference")

    print("KERNEL_OK")
</pallas_src>

<mosaic_0001>
module attributes {stable_mosaic.version = 11 : i64} {
  func.func @dual_kernel(%arg0: memref<128x512xbf16, #tpu.memory_space<vmem>>, %arg1: memref<8x128xbf16, #tpu.memory_space<vmem>>, %arg2: memref<8x8xbf16, #tpu.memory_space<vmem>>, %arg3: memref<8x1xf32, #tpu.memory_space<vmem>>, %arg4: memref<8x512xf32, #tpu.memory_space<vmem>>) attributes {dimension_semantics = [], scalar_prefetch = 0 : i64, scratch_operands = 0 : i64, tpu.core_type = #tpu.core_type<tc>} {
    %c0 = arith.constant 0 : index
    %c0_0 = arith.constant 0 : index
    %0 = vector.load %arg1[%c0, %c0_0] : memref<8x128xbf16, #tpu.memory_space<vmem>>, vector<8x128xbf16>
    %c0_1 = arith.constant 0 : index
    %c0_2 = arith.constant 0 : index
    %1 = vector.load %arg0[%c0_1, %c0_2] : memref<128x512xbf16, #tpu.memory_space<vmem>>, vector<128x512xbf16>
    %cst = arith.constant dense<0.000000e+00> : vector<8x512xf32>
    %2 = tpu.matmul %0, %1, %cst {dimension_numbers = #tpu.dot_dimension_numbers<[1], [0], [0], [1], [0, 0, 1, 1], [], []>} : vector<8x128xbf16>, vector<128x512xbf16>, vector<8x512xf32> -> vector<8x512xf32>
    %cst_3 = arith.constant dense<0.000000e+00> : vector<512xf32>
    %3 = vector.multi_reduction <add>, %2, %cst_3 [0] : vector<8x512xf32> to vector<512xf32>
    %4 = vector.shape_cast %3 : vector<512xf32> to vector<1x512xf32>
    %cst_4 = arith.constant 8.000000e+00 : f32
    %5 = vector.broadcast %cst_4 : f32 to vector<1x512xf32>
    %6 = arith.divf %4, %5 : vector<1x512xf32>
    %7 = vector.broadcast %6 : vector<1x512xf32> to vector<8x512xf32>
    %8 = arith.subf %2, %7 : vector<8x512xf32>
    %9 = arith.mulf %8, %8 : vector<8x512xf32>
    %cst_5 = arith.constant dense<0.000000e+00> : vector<512xf32>
    %10 = vector.multi_reduction <add>, %9, %cst_5 [0] : vector<8x512xf32> to vector<512xf32>
    %11 = vector.shape_cast %10 : vector<512xf32> to vector<1x512xf32>
    %cst_6 = arith.constant 8.000000e+00 : f32
    %12 = vector.broadcast %cst_6 : f32 to vector<1x512xf32>
    %13 = arith.divf %11, %12 : vector<1x512xf32>
    %14 = vector.broadcast %6 : vector<1x512xf32> to vector<8x512xf32>
    %15 = arith.subf %2, %14 : vector<8x512xf32>
    %cst_7 = arith.constant 9.99999997E-7 : f32
    %16 = vector.broadcast %cst_7 : f32 to vector<1x512xf32>
    %17 = arith.addf %13, %16 : vector<1x512xf32>
    %18 = math.rsqrt %17 : vector<1x512xf32>
    %19 = vector.broadcast %18 : vector<1x512xf32> to vector<8x512xf32>
    %20 = arith.mulf %15, %19 : vector<8x512xf32>
    %c0_8 = arith.constant 0 : index
    %c0_9 = arith.constant 0 : index
    %21 = vector.load %arg2[%c0_8, %c0_9] : memref<8x8xbf16, #tpu.memory_space<vmem>>, vector<8x8xbf16>
    %22 = arith.truncf %20 : vector<8x512xf32> to vector<8x512xbf16>
    %cst_10 = arith.constant dense<0.000000e+00> : vector<8x512xf32>
    %23 = tpu.matmul %21, %22, %cst_10 {dimension_numbers = #tpu.dot_dimension_numbers<[1], [0], [0], [1], [0, 0, 1, 1], [], []>} : vector<8x8xbf16>, vector<8x512xbf16>, vector<8x512xf32> -> vector<8x512xf32>
    %c0_11 = arith.constant 0 : index
    %c0_12 = arith.constant 0 : index
    %24 = vector.load %arg3[%c0_11, %c0_12] : memref<8x1xf32, #tpu.memory_space<vmem>>, vector<8x1xf32>
    %25 = vector.broadcast %24 : vector<8x1xf32> to vector<8x512xf32>
    %26 = arith.addf %23, %25 : vector<8x512xf32>
    %cst_13 = arith.constant 5.000000e-01 : f32
    %27 = vector.broadcast %cst_13 : f32 to vector<8x512xf32>
    %28 = arith.mulf %27, %26 : vector<8x512xf32>
    %cst_14 = arith.constant 0.707106769 : f32
    %29 = vector.broadcast %cst_14 : f32 to vector<8x512xf32>
    %30 = arith.mulf %26, %29 : vector<8x512xf32>
    %cst_15 = arith.constant 0.000000e+00 : f32
    %31 = vector.broadcast %cst_15 : f32 to vector<8x512xf32>
    %32 = arith.cmpf oge, %30, %31 : vector<8x512xf32>
    %cst_16 = arith.constant 1.000000e+00 : f32
    %cst_17 = arith.constant -1.000000e+00 : f32
    %33 = vector.broadcast %cst_16 : f32 to vector<8x512xf32>
    %34 = vector.broadcast %cst_17 : f32 to vector<8x512xf32>
    %35 = arith.select %32, %33, %34 : vector<8x512xi1>, vector<8x512xf32>
    %36 = math.absf %30 : vector<8x512xf32>
    %cst_18 = arith.constant 0.327591091 : f32
    %37 = vector.broadcast %cst_18 : f32 to vector<8x512xf32>
    %38 = arith.mulf %37, %36 : vector<8x512xf32>
    %cst_19 = arith.constant 1.000000e+00 : f32
    %39 = vector.broadcast %cst_19 : f32 to vector<8x512xf32>
    %40 = arith.addf %39, %38 : vector<8x512xf32>
    %cst_20 = arith.constant 1.000000e+00 : f32
    %41 = vector.broadcast %cst_20 : f32 to vector<8x512xf32>
    %42 = arith.divf %41, %40 : vector<8x512xf32>
    %cst_21 = arith.constant 1.06140542 : f32
    %43 = vector.broadcast %cst_21 : f32 to vector<8x512xf32>
    %44 = arith.mulf %43, %42 : vector<8x512xf32>
    %cst_22 = arith.constant -1.45315206 : f32
    %45 = vector.broadcast %cst_22 : f32 to vector<8x512xf32>
    %46 = arith.addf %44, %45 : vector<8x512xf32>
    %47 = arith.mulf %46, %42 : vector<8x512xf32>
    %cst_23 = arith.constant 1.42141378 : f32
    %48 = vector.broadcast %cst_23 : f32 to vector<8x512xf32>
    %49 = arith.addf %47, %48 : vector<8x512xf32>
    %50 = arith.mulf %49, %42 : vector<8x512xf32>
    %cst_24 = arith.constant -0.284496725 : f32
    %51 = vector.broadcast %cst_24 : f32 to vector<8x512xf32>
    %52 = arith.addf %50, %51 : vector<8x512xf32>
    %53 = arith.mulf %52, %42 : vector<8x512xf32>
    %cst_25 = arith.constant 0.254829586 : f32
    %54 = vector.broadcast %cst_25 : f32 to vector<8x512xf32>
    %55 = arith.addf %53, %54 : vector<8x512xf32>
    %56 = arith.mulf %55, %42 : vector<8x512xf32>
    %cst_26 = arith.constant 0.000000e+00 : f32
    %57 = vector.broadcast %cst_26 : f32 to vector<8x512xf32>
    %58 = arith.subf %57, %36 : vector<8x512xf32>
    %59 = arith.mulf %58, %36 : vector<8x512xf32>
    %60 = math.exp %59 : vector<8x512xf32>
    %61 = arith.mulf %56, %60 : vector<8x512xf32>
    %cst_27 = arith.constant 1.000000e+00 : f32
    %62 = vector.broadcast %cst_27 : f32 to vector<8x512xf32>
    %63 = arith.subf %62, %61 : vector<8x512xf32>
    %64 = arith.mulf %35, %63 : vector<8x512xf32>
    %cst_28 = arith.constant 1.000000e+00 : f32
    %65 = vector.broadcast %cst_28 : f32 to vector<8x512xf32>
    %66 = arith.addf %65, %64 : vector<8x512xf32>
    %67 = arith.mulf %28, %66 : vector<8x512xf32>
    %c0_29 = arith.constant 0 : index
    %c0_30 = arith.constant 0 : index
    %68 = vector.load %arg4[%c0_29, %c0_30] : memref<8x512xf32, #tpu.memory_space<vmem>>, vector<8x512xf32>
    tpu.vector_store %arg4[%c0_29, %c0_30], %67 {strides = array<i32>} : memref<8x512xf32, #tpu.memory_space<vmem>>, vector<8x512xf32>,
    return
  }
}

</mosaic_0001>

<bundles_post_ra>
// kernel: tpu_custom_call.1
= control target key start
LH: loop header
LB: loop body
LE: loop exit
PB: predicated region body
PF: predicated region fallthrough
CT: control target
= control target key end

     0   :  { %9 = vsyncpa [#allocation3], 0  ;;  %s1034_s0 = inlined_call_operand.hbm [shape: bf16[128,512], index: 0, kind: input, shape index: {}]   ;;  %s1035_s1 = inlined_call_operand.vmem [shape: bf16[8,128], index: 1, kind: input, shape index: {}]   ;;  %s1036_s2 = inlined_call_operand.vmem [shape: bf16[8,8], index: 2, kind: input, shape index: {}]   ;;  %s1037_s3 = inlined_call_operand.vmem [shape: f32[8,1], index: 3, kind: input, shape index: {}]   ;;  %s1038_s4 = inlined_call_operand.hbm [shape: f32[8,512], index: 4, kind: output, shape index: {}]  }
   0x1   :  { %10 = vsyncpa [#allocation4], 0  ;;  %s15_s17 = sshll.u32 %s1034_s0, 4  ;;  %s910_s18 = smov [#allocation2]   ;;  %s16_s17 = int_to_ptr.hbm [resolvable:$true] %s15_s17 }
   0x2   :  { %s17_s19 = sshll.u32 %s910_s18, 4  ;;  %s911_s20 = smov 256   ;;  %s18_s19 = int_to_ptr.vmem [resolvable:$true] %s17_s19 }
   0x3   :  { %s912_s21 = smov 16  }
   0x4   :  { %23 = dma.hbm_to_vmem [thread:$0]  %s16_s17, 4096, %s18_s19, [#allocation3], %s911_s20, %s911_s20, %s912_s21  }
   0x5   :  { %906 = dma.done.wait [#allocation3], 4096  }
   0x6   :  { %907 = vsyncadd [#allocation3], 4294963200  ;;  %v774_v0 = vld [vmem:[#allocation2 + $0xe0] sm:$0xf]  ;;  %v822_v1 = vld [vmem:[#allocation2 + $0xec] sm:$0xf0] }
   0x7   :  { %v820_v2 = vld [vmem:[#allocation2 + $0xe4] sm:$0xf]  ;;  %v775_v3 = vor.u32 %v822_v1, %v774_v0  ;;  %v776_v4 = vld [vmem:[#allocation2 + $0xf0] sm:$0xf0]  ;;  %v782_v5 = vld [vmem:[#allocation2 + $0xe8] sm:$0xf] }
   0x8   :  { %v823_v6 = vld [vmem:[#allocation2 + $0xf4] sm:$0xf0]  ;;  %v779_v7 = vor.u32 %v820_v2, %v776_v4  ;;  %v821_v9 = vld [vmem:[#allocation2 + $0xec] sm:$0xf]  ;;  %v784_v10 = vld [vmem:[#allocation2 + $0xf8] sm:$0xf0] }
   0x9   :  { %v783_v8 = vor.u32 %v823_v6, %v782_v5  ;;  %v758_v11 = vld [vmem:[#allocation2 + $0xc0] sm:$0xf]  ;;  %228 = vmatpush.bf16.msra.mxu0 %v775_v3  ;;  %v787_v12 = vor.u32 %v821_v9, %v784_v10  ;;  %v818_v13 = vld [vmem:[#allocation2 + $0xcc] sm:$0xf0]  ;;  %v816_v14 = vld [vmem:[#allocation2 + $0xc4] sm:$0xf] }
   0xa   :  { %v760_v15 = vld [vmem:[#allocation2 + $0xd0] sm:$0xf0]  ;;  %241 = vmatpush.bf16.msra.mxu1 %v779_v7  ;;  %v759_v16 = vor.u32 %v818_v13, %v758_v11  ;;  %v766_v18 = vld [vmem:[#allocation2 + $0xc8] sm:$0xf]  ;;  %v819_v19 = vld [vmem:[#allocation2 + $0xd4] sm:$0xf0] }
   0xb   :  { %254 = vmatpush.bf16.msra.mxu2 %v783_v8  ;;  %v763_v17 = vor.u32 %v816_v14, %v760_v15  ;;  %v817_v20 = vld [vmem:[#allocation2 + $0xcc] sm:$0xf]  ;;  %267 = vmatpush.bf16.msra.mxu3 %v787_v12  ;;  %v767_v21 = vor.u32 %v819_v19, %v766_v18  ;;  %v768_v22 = vld [vmem:[#allocation2 + $0xd8] sm:$0xf0]  ;;  %v742_v23 = vld [vmem:[#allocation2 + $0xa0] sm:$0xf] }
   0xc   :  { %v814_v24 = vld [vmem:[#allocation2 + $0xac] sm:$0xf0]  ;;  %v771_v25 = vor.u32 %v817_v20, %v768_v22  ;;  %v812_v26 = vld [vmem:[#allocation2 + $0xa4] sm:$0xf]  ;;  %v744_v27 = vld [vmem:[#allocation2 + $0xb0] sm:$0xf0] }
   0xd   :  { %v750_v28 = vld [vmem:[#allocation2 + $0xa8] sm:$0xf]  ;;  %229 = vmatpush.bf16.msra.mxu0 %v759_v16  ;;  %v743_v29 = vor.u32 %v814_v24, %v742_v23  ;;  %v815_v30 = vld [vmem:[#allocation2 + $0xb4] sm:$0xf0]  ;;  %v813_v31 = vld [vmem:[#allocation2 + $0xac] sm:$0xf]  ;;  %v747_v33 = vor.u32 %v812_v26, %v744_v27 }
   0xe   :  { %v752_v32 = vld [vmem:[#allocation2 + $0xb8] sm:$0xf0]  ;;  %242 = vmatpush.bf16.msra.mxu1 %v763_v17  ;;  %v751_v34 = vor.u32 %v815_v30, %v750_v28  ;;  %v726_v35 = vld [vmem:[#allocation2 + $0x80] sm:$0xf]  ;;  %v810_v36 = vld [vmem:[#allocation2 + $0x8c] sm:$0xf0] }
   0xf   :  { %255 = vmatpush.bf16.msra.mxu2 %v767_v21  ;;  %v808_v37 = vld [vmem:[#allocation2 + $0x84] sm:$0xf]  ;;  %268 = vmatpush.bf16.msra.mxu3 %v771_v25  ;;  %v755_v38 = vor.u32 %v813_v31, %v752_v32  ;;  %v728_v39 = vld [vmem:[#allocation2 + $0x90] sm:$0xf0]  ;;  %v734_v40 = vld [vmem:[#allocation2 + $0x88] sm:$0xf]  ;;  %v727_v44 = vor.u32 %v810_v36, %v726_v35 }
  0x10   :  { %v811_v41 = vld [vmem:[#allocation2 + $0x94] sm:$0xf0]  ;;  %v809_v42 = vld [vmem:[#allocation2 + $0x8c] sm:$0xf]  ;;  %v736_v43 = vld [vmem:[#allocation2 + $0x98] sm:$0xf0]  ;;  %v731_v45 = vor.u32 %v808_v37, %v728_v39 }
  0x11   :  { %230 = vmatpush.bf16.msra.mxu0 %v743_v29  ;;  %v735_v46 = vor.u32 %v811_v41, %v734_v40  ;;  %v710_v47 = vld [vmem:[#allocation2 + $0x60] sm:$0xf]  ;;  %v806_v48 = vld [vmem:[#allocation2 + $0x6c] sm:$0xf0]  ;;  %v804_v49 = vld [vmem:[#allocation2 + $0x64] sm:$0xf]  ;;  %v739_v50 = vor.u32 %v809_v42, %v736_v43 }
  0x12   :  { %243 = vmatpush.bf16.msra.mxu1 %v747_v33  ;;  %v712_v51 = vld [vmem:[#allocation2 + $0x70] sm:$0xf0]  ;;  %v718_v52 = vld [vmem:[#allocation2 + $0x68] sm:$0xf]  ;;  %v807_v53 = vld [vmem:[#allocation2 + $0x74] sm:$0xf0]  ;;  %v711_v56 = vor.u32 %v806_v48, %v710_v47 }
  0x13   :  { %256 = vmatpush.bf16.msra.mxu2 %v751_v34  ;;  %269 = vmatpush.bf16.msra.mxu3 %v755_v38  ;;  %v805_v54 = vld [vmem:[#allocation2 + $0x6c] sm:$0xf]  ;;  %v720_v55 = vld [vmem:[#allocation2 + $0x78] sm:$0xf0]  ;;  %v715_v57 = vor.u32 %v804_v49, %v712_v51  ;;  %v719_v58 = vor.u32 %v807_v53, %v718_v52  ;;  %v694_v59 = vld [vmem:[#allocation2 + $0x40] sm:$0xf] }
  0x14   :  { %v802_v60 = vld [vmem:[#allocation2 + $0x4c] sm:$0xf0]  ;;  %v800_v61 = vld [vmem:[#allocation2 + $0x44] sm:$0xf]  ;;  %v723_v62 = vor.u32 %v805_v54, %v720_v55  ;;  %v696_v63 = vld [vmem:[#allocation2 + $0x50] sm:$0xf0] }
  0x15   :  { %231 = vmatpush.bf16.msra.mxu0 %v727_v44  ;;  %v702_v0 = vld [vmem:[#allocation2 + $0x48] sm:$0xf]  ;;  %v803_v1 = vld [vmem:[#allocation2 + $0x54] sm:$0xf0]  ;;  %v801_v2 = vld [vmem:[#allocation2 + $0x4c] sm:$0xf]  ;;  %v695_v4 = vor.u32 %v802_v60, %v694_v59  ;;  %v699_v5 = vor.u32 %v800_v61, %v696_v63 }
  0x16   :  { %244 = vmatpush.bf16.msra.mxu1 %v731_v45  ;;  %v704_v3 = vld [vmem:[#allocation2 + $0x58] sm:$0xf0]  ;;  %v703_v6 = vor.u32 %v803_v1, %v702_v0  ;;  %v678_v7 = vld [vmem:[#allocation2 + $0x20] sm:$0xf]  ;;  %v798_v8 = vld [vmem:[#allocation2 + $0x2c] sm:$0xf0] }
  0x17   :  { %257 = vmatpush.bf16.msra.mxu2 %v735_v46  ;;  %270 = vmatpush.bf16.msra.mxu3 %v739_v50  ;;  %v796_v9 = vld [vmem:[#allocation2 + $0x24] sm:$0xf]  ;;  %v707_v10 = vor.u32 %v801_v2, %v704_v3  ;;  %v680_v11 = vld [vmem:[#allocation2 + $0x30] sm:$0xf0]  ;;  %v686_v12 = vld [vmem:[#allocation2 + $0x28] sm:$0xf]  ;;  %v679_v16 = vor.u32 %v798_v8, %v678_v7 }
  0x18   :  { %v799_v13 = vld [vmem:[#allocation2 + $0x34] sm:$0xf0]  ;;  %v797_v14 = vld [vmem:[#allocation2 + $0x2c] sm:$0xf]  ;;  %v688_v15 = vld [vmem:[#allocation2 + $0x38] sm:$0xf0]  ;;  %v683_v17 = vor.u32 %v796_v9, %v680_v11 }
  0x19   :  { %232 = vmatpush.bf16.msra.mxu0 %v711_v56  ;;  %v687_v18 = vor.u32 %v799_v13, %v686_v12  ;;  %v662_v19 = vld [vmem:[#allocation2] sm:$0xf]  ;;  %v794_v20 = vld [vmem:[#allocation2 + $0xc] sm:$0xf0]  ;;  %v792_v21 = vld [vmem:[#allocation2 + $0x4] sm:$0xf]  ;;  %v691_v22 = vor.u32 %v797_v14, %v688_v15 }
  0x1a   :  { %245 = vmatpush.bf16.msra.mxu1 %v715_v57  ;;  %v664_v23 = vld [vmem:[#allocation2 + $0x10] sm:$0xf0]  ;;  %v670_v24 = vld [vmem:[#allocation2 + $0x8] sm:$0xf]  ;;  %v795_v25 = vld [vmem:[#allocation2 + $0x14] sm:$0xf0]  ;;  %v663_v28 = vor.u32 %v794_v20, %v662_v19 }
  0x1b   :  { %258 = vmatpush.bf16.msra.mxu2 %v719_v58  ;;  %271 = vmatpush.bf16.msra.mxu3 %v723_v62  ;;  %v793_v26 = vld [vmem:[#allocation2 + $0xc] sm:$0xf]  ;;  %v672_v27 = vld [vmem:[#allocation2 + $0x18] sm:$0xf0]  ;;  %v667_v29 = vor.u32 %v792_v21, %v664_v23  ;;  %v671_v30 = vor.u32 %v795_v25, %v670_v24  ;;  %v35_v32 = vld [vmem:[%s1035_s1] sm:$0xf] }
  0x1c   :  { %v675_v31 = vor.u32 %v793_v26, %v672_v27  ;;  %v913_v33 = vmov 8.0   ;;  %vm414_vm7 = vcmask 1043456   ;;  %vm410_vm11 = vcmask 64512   ;;  %s650_s28 = sshll.u32 %s1038_s4, 4  ;;  %s651_s28 = int_to_ptr.hbm [resolvable:$true] %s650_s28 }
  0x1d   :  { %233 = vmatpush.bf16.msra.mxu0 %v695_v4  ;;  %832 = vrcp.f32 %v913_v33 }
  0x1e   :  { %246 = vmatpush.bf16.msra.mxu1 %v699_v5 }
  0x1f   :  { %259 = vmatpush.bf16.msra.mxu2 %v703_v6  ;;  %272 = vmatpush.bf16.msra.mxu3 %v707_v10 }
  0x21   :  { %234 = vmatpush.bf16.msra.mxu0 %v679_v16 }
  0x22   :  { %247 = vmatpush.bf16.msra.mxu1 %v683_v17 }
  0x23   :  { %260 = vmatpush.bf16.msra.mxu2 %v687_v18  ;;  %273 = vmatpush.bf16.msra.mxu3 %v691_v22  ;;  %v833_v34 = vpop.eup %832 }
  0x24   :  { %v305_v35 = vmul.f32 8.0, %v833_v34  ;;  %vm309_vm0 = vweird.f32 %v833_v34 }
  0x25   :  { %235 = vmatpush.bf16.msra.mxu0 %v663_v28 }
  0x26   :  { %248 = vmatpush.bf16.msra.mxu1 %v667_v29  ;;  %v306_v36 = vsub.f32 1.0, %v305_v35 }
  0x27   :  { %261 = vmatpush.bf16.msra.mxu2 %v671_v30  ;;  %274 = vmatpush.bf16.msra.mxu3 %v675_v31 }
  0x28   :  { %236 = vmatmul.bf16.vlgmr.msra.gmra.mxu0 %v35_v32  ;;  %v307_v40 = vmul.f32 %v833_v34, %v306_v36 }
  0x29   :  { %249 = vmatmul.bf16.vlgmr.msra.gmra.mxu1 %v35_v32 }
  0x2a   :  { %262 = vmatmul.bf16.vlgmr.msra.gmra.mxu2 %v35_v32  ;;  %275 = vmatmul.bf16.vlgmr.msra.gmra.mxu3 %v35_v32  ;;  %v308_v45 = vadd.f32 %v833_v34, %v307_v40 }
  0x2c   :  { %v310_v56 = vsel %vm309_vm0, %v833_v34, %v308_v45 }
  0xa5   :  { %v237_v37 = vpop.f32.mrf.mxu0 }
  0xa6   :  { %v280_v38 = vrot.slane %v237_v37, 4  ;;  %v250_v39 = vpop.f32.mrf.mxu1 }
  0xa7   :  { %v286_v41 = vrot.slane %v250_v39, 4 }
  0xa8   :  { %v281_v42 = vadd.f32 %v280_v38, %v237_v37 }
  0xa9   :  { %v287_v43 = vadd.f32 %v286_v41, %v250_v39 }
  0xaa   :  { %v282_v44 = vrot.slane %v281_v42, 2 }
  0xab   :  { %v288_v46 = vrot.slane %v287_v43, 2 }
  0xac   :  { %v283_v47 = vadd.f32 %v282_v44, %v281_v42 }
  0xad   :  { %v263_v48 = vpop.f32.mrf.mxu2  ;;  %v289_v49 = vadd.f32 %v288_v46, %v287_v43  ;;  %v276_v51 = vpop.f32.mrf.mxu3 }
  0xae   :  { %v292_v50 = vrot.slane %v263_v48, 4  ;;  %v239_v52 = vpop.f32.mrf.mxu0  ;;  %v284_v53 = vrot.slane %v283_v47, 1  ;;  %v298_v54 = vrot.slane %v276_v51, 4  ;;  %v252_v55 = vpop.f32.mrf.mxu1 }
  0xaf   :  { %v290_v57 = vrot.slane %v289_v49, 1 }
  0xb0   :  { %v293_v58 = vadd.f32 %v292_v50, %v263_v48  ;;  %v285_v59 = vadd.f32 %v284_v53, %v283_v47  ;;  %v299_v60 = vadd.f32 %v298_v54, %v276_v51  ;;  %v914_v50 = vmov 0  }
  0xb1   :  { %v291_v61 = vadd.f32 %v290_v57, %v289_v49  ;;  %831 = vset.pattern.permute.xlu0 %v914_v50 }
  0xb2   :  { %v294_v62 = vrot.slane %v293_v58, 2  ;;  %v311_v63 = vmul.f32 %v310_v56, %v285_v59  ;;  %v300_v0 = vrot.slane %v299_v60, 2 }
  0xb3   :  { %v312_v1 = vmul.f32 %v310_v56, %v291_v61 }
  0xb4   :  { %v295_v2 = vadd.f32 %v294_v62, %v293_v58  ;;  %v948_v3 = vsub.f32 %v237_v37, %v311_v63  ;;  %v301_v4 = vadd.f32 %v300_v0, %v299_v60 }
  0xb5   :  { %v265_v5 = vpop.f32.mrf.mxu2  ;;  %v950_v6 = vsub.f32 %v250_v39, %v312_v1  ;;  %v278_v8 = vpop.f32.mrf.mxu3 }
  0xb6   :  { %v296_v7 = vrot.slane %v295_v2, 1  ;;  %v319_v9 = vmul.f32 %v948_v3, %v948_v3  ;;  %v302_v10 = vrot.slane %v301_v4, 1 }
  0xb7   :  { %v320_v11 = vmul.f32 %v950_v6, %v950_v6 }
  0xb8   :  { %v297_v12 = vadd.f32 %v296_v7, %v295_v2  ;;  %v323_v13 = vrot.slane %v319_v9, 4  ;;  %v303_v14 = vadd.f32 %v302_v10, %v301_v4 }
  0xb9   :  { %v329_v15 = vrot.slane %v320_v11, 4 }
  0xba   :  { %v313_v16 = vmul.f32 %v310_v56, %v297_v12  ;;  %v324_v17 = vadd.f32 %v323_v13, %v319_v9  ;;  %v314_v18 = vmul.f32 %v310_v56, %v303_v14 }
  0xbb   :  { %v330_v19 = vadd.f32 %v329_v15, %v320_v11 }
  0xbc   :  { %v956_v20 = vsub.f32 %v263_v48, %v313_v16  ;;  %v325_v21 = vrot.slane %v324_v17, 2  ;;  %v958_v22 = vsub.f32 %v276_v51, %v314_v18  ;;  %v404_v48 = vld [vmem:[%s1037_s3] sm:$0xff] }
  0xbd   :  { %v331_v23 = vrot.slane %v330_v19, 2  ;;  %407 = vperm.xlu0 %831, %v404_v48  }
  0xbe   :  { %v321_v24 = vmul.f32 %v956_v20, %v956_v20  ;;  %v326_v25 = vadd.f32 %v325_v21, %v324_v17  ;;  %v322_v26 = vmul.f32 %v958_v22, %v958_v22 }
  0xbf   :  { %v332_v27 = vadd.f32 %v331_v23, %v330_v19 }
  0xc0   :  { %v335_v28 = vrot.slane %v321_v24, 4  ;;  %v327_v29 = vrot.slane %v326_v25, 1  ;;  %v341_v30 = vrot.slane %v322_v26, 4 }
  0xc1   :  { %v333_v31 = vrot.slane %v332_v27, 1 }
  0xc2   :  { %v336_v32 = vadd.f32 %v335_v28, %v321_v24  ;;  %v328_v33 = vadd.f32 %v327_v29, %v326_v25  ;;  %v342_v34 = vadd.f32 %v341_v30, %v322_v26 }
  0xc3   :  { %v334_v35 = vadd.f32 %v333_v31, %v332_v27 }
  0xc4   :  { %v337_v36 = vrot.slane %v336_v32, 2  ;;  %v343_v37 = vrot.slane %v342_v34, 2  ;;  %v347_v38 = vmul.f32 %v328_v33, %v310_v56 }
  0xc5   :  { %v348_v40 = vmul.f32 %v334_v35, %v310_v56 }
  0xc6   :  { %v338_v39 = vadd.f32 %v337_v36, %v336_v32  ;;  %v344_v41 = vadd.f32 %v343_v37, %v342_v34  ;;  %v351_v42 = vadd.f32 1e-06, %v347_v38 }
  0xc7   :  { %v352_v44 = vadd.f32 1e-06, %v348_v40 }
  0xc8   :  { %v339_v43 = vrot.slane %v338_v39, 1  ;;  %v345_v45 = vrot.slane %v344_v41, 1  ;;  %834 = vrsqrt.f32 %v351_v42  ;;  %vm361_vm3 = vweird.f32 %v351_v42 }
  0xc9   :  { %836 = vrsqrt.f32 %v352_v44  ;;  %vm371_vm5 = vweird.f32 %v352_v44 }
  0xca   :  { %v340_v46 = vadd.f32 %v339_v43, %v338_v39  ;;  %v346_v47 = vadd.f32 %v345_v45, %v344_v41 }
  0xcc   :  { %v349_v49 = vmul.f32 %v340_v46, %v310_v56  ;;  %v350_v51 = vmul.f32 %v346_v47, %v310_v56 }
  0xce   :  { %v353_v52 = vadd.f32 1e-06, %v349_v49  ;;  %v835_v53 = vpop.eup %834  ;;  %v354_v54 = vadd.f32 1e-06, %v350_v51 }
  0xcf   :  { %v837_v55 = vpop.eup %836  ;;  %v356_v57 = vmul.f32 %v835_v53, %v351_v42  ;;  %vm362_vm1 = vweird.f32 %v835_v53 }
  0xd0   :  { %838 = vrsqrt.f32 %v353_v52  ;;  %v366_v58 = vmul.f32 %v837_v55, %v352_v44  ;;  %vm372_vm2 = vweird.f32 %v837_v55  ;;  %vm363_vm4 = vmor %vm361_vm3, %vm362_vm1  ;;  %vm381_vm10 = vweird.f32 %v353_v52 }
  0xd1   :  { %840 = vrsqrt.f32 %v354_v54  ;;  %v357_v59 = vmul.f32 %v835_v53, %v356_v57  ;;  %vm373_vm6 = vmor %vm371_vm5, %vm372_vm2  ;;  %vm391_vm13 = vweird.f32 %v354_v54 }
  0xd2   :  { %v367_v60 = vmul.f32 %v837_v55, %v366_v58 }
  0xd3   :  { %v358_v61 = vmul.f32 0.5, %v357_v59 }
  0xd4   :  { %v368_v62 = vmul.f32 0.5, %v367_v60 }
  0xd5   :  { %v359_v0 = vsub.f32 1.5, %v358_v61 }
  0xd6   :  { %v839_v63 = vpop.eup %838  ;;  %v369_v2 = vsub.f32 1.5, %v368_v62 }
  0xd7   :  { %v841_v1 = vpop.eup %840  ;;  %v376_v56 = vmul.f32 %v839_v63, %v353_v52  ;;  %v360_v4 = vmul.f32 %v835_v53, %v359_v0  ;;  %vm382_vm8 = vweird.f32 %v839_v63 }
  0xd8   :  { %v386_v5 = vmul.f32 %v841_v1, %v354_v54  ;;  %v370_v7 = vmul.f32 %v837_v55, %v369_v2  ;;  %vm392_vm9 = vweird.f32 %v841_v1  ;;  %vm383_vm12 = vmor %vm381_vm10, %vm382_vm8 }
  0xd9   :  { %v377_v8 = vmul.f32 %v839_v63, %v376_v56  ;;  %v364_v9 = vsel %vm363_vm4, %v835_v53, %v360_v4  ;;  %vm393_vm14 = vmor %vm391_vm13, %vm392_vm9 }
  0xda   :  { %v387_v10 = vmul.f32 %v841_v1, %v386_v5  ;;  %v395_v11 = vmul.f32 %v364_v9, %v948_v3  ;;  %v374_v12 = vsel %vm373_vm6, %v837_v55, %v370_v7  ;;  %v399_v3 = vld [vmem:[%s1036_s2] sm:$0xf]  ;;  %s916_s2 = smov [#allocation5]  }
  0xdb   :  { %v378_v13 = vmul.f32 0.5, %v377_v8  ;;  %v396_v14 = vmul.f32 %v374_v12, %v950_v6  ;;  %s648_s25 = sshll.u32 %s916_s2, 4  ;;  %s649_s25 = int_to_ptr.vmem [resolvable:$true] %s648_s25 }
  0xdc   :  { %v388_v15 = vmul.f32 0.5, %v387_v10  ;;  %v400_v16 = vpack.c.bf16 %v395_v11, %v395_v11 }
  0xdd   :  { %v379_v17 = vsub.f32 1.5, %v378_v13  ;;  %v401_v18 = vpack.c.bf16 %v396_v14, %v396_v14 }
  0xde   :  { %v389_v19 = vsub.f32 1.5, %v388_v15  ;;  %v416_v21 = vsel %vm414_vm7, %v400_v16, 0 }
  0xdf   :  { %v380_v23 = vmul.f32 %v839_v63, %v379_v17  ;;  %434 = vmatpush.bf16.msrb.mxu0 %v416_v21  ;;  %v419_v24 = vsel %vm414_vm7, %v401_v18, 0 }
  0xe0   :  { %v390_v6 = vmul.f32 %v841_v1, %v389_v19  ;;  %447 = vmatpush.bf16.msrb.mxu1 %v419_v24 }
  0xe1   :  { %v384_v25 = vsel %vm383_vm12, %v839_v63, %v380_v23 }
  0xe2   :  { %v397_v26 = vmul.f32 %v384_v25, %v956_v20  ;;  %v394_v27 = vsel %vm393_vm14, %v841_v1, %v390_v6  ;;  %788 = vmatmul.msk.bf16.vlgmr.msrb.gmra.mxu0 %vm410_vm11, %v399_v3 }
  0xe3   :  { %v398_v28 = vmul.f32 %v394_v27, %v958_v22  ;;  %789 = vmatmul.msk.bf16.vlgmr.msrb.gmra.mxu1 %vm410_vm11, %v399_v3 }
  0xe4   :  { %v402_v29 = vpack.c.bf16 %v397_v26, %v397_v26 }
  0xe5   :  { %v403_v30 = vpack.c.bf16 %v398_v28, %v398_v28 }
  0xe6   :  { %v422_v31 = vsel %vm414_vm7, %v402_v29, 0 }
  0xe7   :  { %460 = vmatpush.bf16.msrb.mxu2 %v422_v31  ;;  %v425_v32 = vsel %vm414_vm7, %v403_v30, 0 }
  0xe8   :  { %473 = vmatpush.bf16.msrb.mxu3 %v425_v32 }
  0xea   :  { %790 = vmatmul.msk.bf16.vlgmr.msrb.gmra.mxu2 %vm410_vm11, %v399_v3 }
  0xeb   :  { %791 = vmatmul.msk.bf16.vlgmr.msrb.gmra.mxu3 %vm410_vm11, %v399_v3 }
 0x12f   :  { %v408_v20 = vpop.permute.xlu0 %407 }
 0x15f   :  { %v436_v33 = vpop.f32.mrf.mxu0 }
 0x160   :  { %v982_v34 = vadd.f32 %v436_v33, %v408_v20  ;;  %v449_v35 = vpop.f32.mrf.mxu1 }
 0x161   :  { %v984_v22 = vadd.f32 %v449_v35, %v408_v20 }
 0x162   :  { %v987_v36 = vmul.f32 0.70710677, %v982_v34 }
 0x163   :  { %v990_v37 = vmul.f32 0.70710677, %v984_v22 }
 0x164   :  { %v495_v38 = vand.u32 2147483647, %v987_v36 }
 0x165   :  { %v994_v39 = vand.u32 2147483647, %v990_v37 }
 0x166   :  { %v499_v40 = vmul.f32 0.3275911, %v495_v38  ;;  %v603_v8 = vsub.f32 0.0, %v495_v38 }
 0x167   :  { %v500_v41 = vmul.f32 0.3275911, %v994_v39  ;;  %v438_v42 = vpop.f32.mrf.mxu0  ;;  %v604_v18 = vsub.f32 0.0, %v994_v39 }
 0x168   :  { %v503_v43 = vadd.f32 1.0, %v499_v40  ;;  %v451_v44 = vpop.f32.mrf.mxu1  ;;  %v607_v21 = vmul.f32 %v603_v8, %v495_v38 }
 0x169   :  { %v504_v45 = vadd.f32 1.0, %v500_v41  ;;  %v608_v29 = vmul.f32 %v604_v18, %v994_v39 }
 0x16a   :  { %842 = vrcp.f32 %v503_v43  ;;  %vm512_vm15 = vweird.f32 %v503_v43  ;;  %v516_v57 = vand.u32 2147483647, %v503_v43  ;;  %v518_v58 = vand.u32 2147483648, %v503_v43 }
 0x16b   :  { %844 = vrcp.f32 %v504_v45  ;;  %vm527_vm0 = vweird.f32 %v504_v45  ;;  %v533_v61 = vand.u32 2147483648, %v504_v45  ;;  %v531_v0 = vand.u32 2147483647, %v504_v45 }
 0x16c   :  { %v519_v7 = vor.u32 1.1754944e-38, %v518_v58  ;;  %vm517_vm4 = vcmp.eq.f32.partialorder %v516_v57, 8.507059e+37  ;;  %v611_v28 = vmul.f32 1.442695, %v607_v21 }
 0x16d   :  { %v462_v46 = vpop.f32.mrf.mxu2  ;;  %v534_v12 = vor.u32 1.1754944e-38, %v533_v61  ;;  %vm532_vm6 = vcmp.eq.f32.partialorder %v531_v0, 8.507059e+37 }
 0x16e   :  { %v997_v47 = vadd.f32 %v462_v46, %v408_v20  ;;  %v475_v48 = vpop.f32.mrf.mxu3 }
 0x16f   :  { %v999_v49 = vadd.f32 %v475_v48, %v408_v20 }
 0x170   :  { %v1002_v50 = vmul.f32 0.70710677, %v997_v47  ;;  %v843_v51 = vpop.eup %842 }
 0x171   :  { %v1005_v52 = vmul.f32 0.70710677, %v999_v49  ;;  %v845_v53 = vpop.eup %844  ;;  %v508_v54 = vmul.f32 %v843_v51, %v503_v43  ;;  %vm513_vm1 = vweird.f32 %v843_v51  ;;  %v613_v43 = vmul.f32 1.442695, %v608_v29 }
 0x172   :  { %v1008_v55 = vand.u32 2147483647, %v1002_v50  ;;  %v523_v59 = vmul.f32 %v845_v53, %v504_v45  ;;  %vm528_vm2 = vweird.f32 %v845_v53  ;;  %vm514_vm3 = vmor %vm512_vm15, %vm513_vm1  ;;  %vm487_vm15 = vcmp.ge.f32.partialorder %v987_v36, 0.0 }
 0x173   :  { %v509_v60 = vsub.f32 1.0, %v508_v54  ;;  %v1012_v1 = vand.u32 2147483647, %v1005_v52  ;;  %vm529_vm5 = vmor %vm527_vm0, %vm528_vm2  ;;  %vm488_vm0 = vcmp.ge.f32.partialorder %v990_v37, 0.0  ;;  %vm489_vm1 = vcmp.ge.f32.partialorder %v1002_v50, 0.0 }
 0x174   :  { %v501_v62 = vmul.f32 0.3275911, %v1008_v55  ;;  %v524_v63 = vsub.f32 1.0, %v523_v59  ;;  %v605_v61 = vsub.f32 0.0, %v1008_v55  ;;  %vm490_vm2 = vcmp.ge.f32.partialorder %v1005_v52, 0.0 }
 0x175   :  { %v464_v2 = vpop.f32.mrf.mxu2  ;;  %v510_v56 = vmul.f32 %v843_v51, %v509_v60  ;;  %v502_v10 = vmul.f32 0.3275911, %v1012_v1  ;;  %v482_v50 = vmul.f32 0.5, %v999_v49 }
 0x176   :  { %v505_v4 = vadd.f32 1.0, %v501_v62  ;;  %v477_v5 = vpop.f32.mrf.mxu3  ;;  %v525_v9 = vmul.f32 %v845_v53, %v524_v63 }
 0x177   :  { %v511_v11 = vadd.f32 %v843_v51, %v510_v56  ;;  %v506_v14 = vadd.f32 1.0, %v502_v10  ;;  %v609_v10 = vmul.f32 %v605_v61, %v1008_v55  ;;  %v915_v55 = vmov -1.0  }
 0x178   :  { %846 = vrcp.f32 %v505_v4  ;;  %v526_v13 = vadd.f32 %v845_v53, %v525_v9  ;;  %v546_v32 = vand.u32 2147483647, %v505_v4  ;;  %v548_v35 = vand.u32 2147483648, %v505_v4 }
 0x179   :  { %v515_v15 = vsel %vm514_vm3, %v843_v51, %v511_v11  ;;  %848 = vrcp.f32 %v506_v14  ;;  %vm542_vm8 = vweird.f32 %v505_v4  ;;  %v561_v51 = vand.u32 2147483647, %v506_v14 }
 0x17a   :  { %v520_v16 = vsel %vm517_vm4, %v519_v7, %v515_v15  ;;  %v530_v17 = vsel %vm529_vm5, %v845_v53, %v526_v13  ;;  %850 = vpow2.f32 %v611_v28  ;;  %vm547_vm9 = vcmp.eq.f32.partialorder %v546_v32, 8.507059e+37 }
 0x17b   :  { %v567_v19 = vmul.f32 1.0614054, %v520_v16  ;;  %v535_v23 = vsel %vm532_vm6, %v534_v12, %v530_v17  ;;  %v549_v39 = vor.u32 1.1754944e-38, %v548_v35  ;;  %v563_v53 = vand.u32 2147483648, %v506_v14 }
 0x17c   :  { %v568_v24 = vmul.f32 1.0614054, %v535_v23  ;;  %852 = vpow2.f32 %v613_v43  ;;  %vm557_vm12 = vweird.f32 %v506_v14  ;;  %vm562_vm14 = vcmp.eq.f32.partialorder %v561_v51, 8.507059e+37 }
 0x17d   :  { %v571_v6 = vadd.f32 -1.4531521, %v567_v19  ;;  %v606_v12 = vsub.f32 0.0, %v1012_v1  ;;  %v492_v29 = vsel %vm488_vm0, 1.0, %v915_v55  ;;  %v479_v32 = vmul.f32 0.5, %v982_v34 }
 0x17e   :  { %v847_v3 = vpop.eup %846  ;;  %v572_v25 = vadd.f32 -1.4531521, %v568_v24 }
 0x17f   :  { %v538_v26 = vmul.f32 %v847_v3, %v505_v4  ;;  %v575_v27 = vmul.f32 %v571_v6, %v520_v16  ;;  %v849_v20 = vpop.eup %848  ;;  %vm543_vm7 = vweird.f32 %v847_v3  ;;  %v564_v4 = vor.u32 1.1754944e-38, %v563_v53 }
 0x180   :  { %v576_v30 = vmul.f32 %v572_v25, %v535_v23  ;;  %v553_v38 = vmul.f32 %v849_v20, %v506_v14  ;;  %vm544_vm10 = vmor %vm542_vm8, %vm543_vm7  ;;  %vm558_vm11 = vweird.f32 %v849_v20  ;;  %v851_v2 = vpop.eup %850  ;;  %v615_v6 = vmul.f32 1.442695, %v609_v10 }
 0x181   :  { %v539_v31 = vsub.f32 1.0, %v538_v26  ;;  %v579_v33 = vadd.f32 1.4214138, %v575_v27  ;;  %vm559_vm13 = vmor %vm557_vm12, %vm558_vm11  ;;  %v491_v25 = vsel %vm487_vm15, 1.0, %v915_v55  ;;  %v493_v53 = vsel %vm489_vm1, 1.0, %v915_v55 }
 0x182   :  { %v580_v40 = vadd.f32 1.4214138, %v576_v30  ;;  %v554_v46 = vsub.f32 1.0, %v553_v38  ;;  %v853_v18 = vpop.eup %852  ;;  %854 = vpow2.f32 %v615_v6 }
 0x183   :  { %v540_v41 = vmul.f32 %v847_v3, %v539_v31  ;;  %v583_v42 = vmul.f32 %v579_v33, %v520_v16  ;;  %v480_v33 = vmul.f32 0.5, %v984_v22 }
 0x184   :  { %v584_v44 = vmul.f32 %v580_v40, %v535_v23  ;;  %v555_v58 = vmul.f32 %v849_v20, %v554_v46 }
 0x185   :  { %v541_v45 = vadd.f32 %v847_v3, %v540_v41  ;;  %v587_v48 = vadd.f32 -0.28449672, %v583_v42 }
 0x186   :  { %v588_v54 = vadd.f32 -0.28449672, %v584_v44  ;;  %v556_v0 = vadd.f32 %v849_v20, %v555_v58  ;;  %v481_v58 = vmul.f32 0.5, %v997_v47 }
 0x187   :  { %v545_v57 = vsel %vm544_vm10, %v847_v3, %v541_v45  ;;  %v591_v59 = vmul.f32 %v587_v48, %v520_v16 }
 0x188   :  { %v550_v60 = vsel %vm547_vm9, %v549_v39, %v545_v57  ;;  %v592_v62 = vmul.f32 %v588_v54, %v535_v23  ;;  %v560_v8 = vsel %vm559_vm13, %v849_v20, %v556_v0  ;;  %v855_v46 = vpop.eup %854 }
 0x189   :  { %v569_v63 = vmul.f32 1.0614054, %v550_v60  ;;  %v595_v56 = vadd.f32 0.2548296, %v591_v59  ;;  %v565_v11 = vsel %vm562_vm14, %v564_v4, %v560_v8 }
 0x18a   :  { %v596_v5 = vadd.f32 0.2548296, %v592_v62  ;;  %v570_v17 = vmul.f32 1.0614054, %v565_v11  ;;  %v494_v62 = vsel %vm490_vm2, 1.0, %v915_v55 }
 0x18b   :  { %v573_v7 = vadd.f32 -1.4531521, %v569_v63  ;;  %v599_v9 = vmul.f32 %v595_v56, %v520_v16  ;;  %v610_v16 = vmul.f32 %v606_v12, %v1012_v1 }
 0x18c   :  { %v600_v13 = vmul.f32 %v596_v5, %v535_v23  ;;  %v574_v24 = vadd.f32 -1.4531521, %v570_v17 }
 0x18d   :  { %v577_v15 = vmul.f32 %v573_v7, %v550_v60  ;;  %v619_v14 = vmul.f32 %v851_v2, %v599_v9  ;;  %v617_v20 = vmul.f32 1.442695, %v610_v16 }
 0x18e   :  { %v620_v19 = vmul.f32 %v853_v18, %v600_v13  ;;  %v578_v23 = vmul.f32 %v574_v24, %v565_v11 }
 0x18f   :  { %v581_v21 = vadd.f32 1.4214138, %v577_v15  ;;  %v623_v3 = vsub.f32 1.0, %v619_v14  ;;  %856 = vpow2.f32 %v617_v20 }
 0x190   :  { %v624_v26 = vsub.f32 1.0, %v620_v19  ;;  %v582_v36 = vadd.f32 1.4214138, %v578_v23 }
 0x191   :  { %v585_v27 = vmul.f32 %v581_v21, %v550_v60  ;;  %v627_v28 = vmul.f32 %v623_v3, %v491_v25 }
 0x192   :  { %v628_v30 = vmul.f32 %v624_v26, %v492_v29  ;;  %v586_v1 = vmul.f32 %v582_v36, %v565_v11 }
 0x193   :  { %v589_v31 = vadd.f32 -0.28449672, %v585_v27  ;;  %v631_v37 = vadd.f32 1.0, %v627_v28 }
 0x194   :  { %v632_v35 = vadd.f32 1.0, %v628_v30  ;;  %v590_v43 = vadd.f32 -0.28449672, %v586_v1 }
 0x195   :  { %v593_v40 = vmul.f32 %v589_v31, %v550_v60  ;;  %v635_v41 = vmul.f32 %v631_v37, %v479_v32  ;;  %v857_v22 = vpop.eup %856 }
 0x196   :  { %v636_v38 = vmul.f32 %v632_v35, %v480_v33  ;;  %v594_v45 = vmul.f32 %v590_v43, %v565_v11 }
 0x197   :  { %v597_v42 = vadd.f32 0.2548296, %v593_v40  ;;  %639 = vst [vmem:[#allocation5] sm:$0xff] %v635_v41 }
 0x198   :  { %640 = vst [vmem:[#allocation5 + $0x8] sm:$0xff] %v636_v38  ;;  %v598_v48 = vadd.f32 0.2548296, %v594_v45 }
 0x199   :  { %v601_v44 = vmul.f32 %v597_v42, %v550_v60 }
 0x19a   :  { %v602_v51 = vmul.f32 %v598_v48, %v565_v11 }
 0x19b   :  { %v621_v34 = vmul.f32 %v855_v46, %v601_v44 }
 0x19c   :  { %v622_v57 = vmul.f32 %v857_v22, %v602_v51 }
 0x19d   :  { %v625_v39 = vsub.f32 1.0, %v621_v34 }
 0x19e   :  { %v626_v61 = vsub.f32 1.0, %v622_v57 }
 0x19f   :  { %v629_v54 = vmul.f32 %v625_v39, %v493_v53 }
 0x1a0   :  { %v630_v63 = vmul.f32 %v626_v61, %v494_v62 }
 0x1a1   :  { %v633_v59 = vadd.f32 1.0, %v629_v54 }
 0x1a2   :  { %v634_v0 = vadd.f32 1.0, %v630_v63 }
 0x1a3   :  { %v637_v60 = vmul.f32 %v633_v59, %v481_v58 }
 0x1a4   :  { %v638_v2 = vmul.f32 %v634_v0, %v482_v50 }
 0x1a5   :  { %641 = vst [vmem:[#allocation5 + $0x10] sm:$0xff] %v637_v60 }
 0x1a6   :  { %642 = vst [vmem:[#allocation5 + $0x18] sm:$0xff] %v638_v2 }
 0x1a7   :  { %653 = dma.vmem_to_hbm [thread:$0]  %s649_s25, 512, %s651_s28, [#allocation4]  }
 0x1a8   :  { %908 = dma.done.wait [#allocation4], 512  }
 0x1a9   :  { %909 = vsyncadd [#allocation4], 4294966784 }
 0x1aa   :  { %658 = vsyncpa [#allocation3], 1 }
 0x1ab   :  { %659 = vsyncpa [#allocation4], 1 }

</bundles_post_ra>
